<compile_context>
chip_gen: v7x
topology: tpu7x:2x2x1
jax: 0.10.0
libtpu: 0.0.40
codegen_flags: <defaults>
</compile_context>

<pallas_src>
import functools

import jax
import jax.numpy as jnp
import numpy as np
from jax import lax
from jax.experimental import pallas as pl
from jax.experimental.pallas import tpu as pltpu


def _pick_images_per_step(N, C):
    """Images per grid step.

    Constraints / goals:
      * divides N (even grid),
      * block second-minor dim NB*C is a multiple of 8 or covers the full
        array (the (8,128) BlockSpec rule),
      * fill >= 8 sublanes per vreg,
      * keep >= 2 grid steps when the batch allows (v7x has 2 TensorCores),
      * keep the (NB*C)^2 block-diagonal weight matrices small.
    """
    legal = [nb for nb in range(1, N + 1)
             if N % nb == 0
             and ((nb * C) % 8 == 0 or nb == N)
             and nb * C <= 512]
    pref = [nb for nb in legal if nb * C >= 8 and (N // nb) >= 2 and nb <= 16]
    if pref:
        return max(pref)          # fill sublanes AND keep >=2 steps
    filled = [nb for nb in legal if nb * C >= 8]
    if filled:
        return min(filled)        # e.g. whole batch when N is tiny
    return max(legal) if legal else N


def _make_kernel(W, HW, PAD, NBC):
    KS = 3

    def kernel(mask_ref, wg_ref, wd_ref, bsum_ref, wpb_ref, x_ref, out_ref, pad_ref):
        # mask_ref: (2, HW)          0/1 f32; row 0: dx=-1 valid, row 1: dx=+1 valid
        # wg_ref  : (NBC, 9)         gate weights, tiled per image
        # wd_ref  : (NBC, 9)         depthwise weights, tiled per image
        # bsum_ref: (NBC, NBC)       block-diag ones: per-image channel sum + broadcast
        # wpb_ref : (NBC, NBC)       block-diag kron(I_NB, Wp): per-image pointwise 1x1
        # x_ref   : (NBC, HW)        NB images, lane-dense flattened NCHW slab
        # out_ref : (NBC, HW)
        # pad_ref : (NBC, PAD+HW+PAD) zero-bordered scratch for the 3x3 taps

        x = x_ref[...].astype(jnp.float32)                # (NBC, HW)
        mask_m = mask_ref[0:1, :]                         # (1, HW) dx = -1 valid
        mask_p = mask_ref[1:2, :]                         # (1, HW) dx = +1 valid

        # Zero only the two 128-lane border tiles; the image region is always
        # fully overwritten before each conv (robust under "parallel" sharding).
        border = jnp.zeros((NBC, PAD), jnp.float32)
        pad_ref[:, :PAD] = border
        pad_ref[:, PAD + HW:] = border

        def conv3x3(w_ref):
            # 3x3 SAME conv per row (each row is one flattened image plane).
            # Vertical OOB taps land in the zero borders; horizontal row-wrap
            # taps are killed by one mask per dx column.
            padded = pad_ref[...]                         # (NBC, PAD+HW+PAD)

            def dx_col(dx):
                acc = None
                for dy in (-1, 0, 1):
                    t = (dy + 1) * KS + (dx + 1)          # PyTorch OIHW tap index
                    s = dy * W + dx                       # flat shift of this tap
                    term = padded[:, PAD + s:PAD + s + HW] * w_ref[:, t:t + 1]
                    acc = term if acc is None else acc + term
                return acc

            return dx_col(0) + mask_m * dx_col(-1) + mask_p * dx_col(1)

        # ---- gate: sigmoid(Conv2d(C -> 1, 3x3, SAME)), replicated per channel row.
        pad_ref[:, PAD:PAD + HW] = x
        g_per_c = conv3x3(wg_ref)                                         # (NBC, HW)
        gate = jax.nn.sigmoid(
            jnp.dot(bsum_ref[...], g_per_c, preferred_element_type=jnp.float32))

        # ---- depthwise 3x3 on y = x * importance (zero-padded borders).
        pad_ref[:, PAD:PAD + HW] = x * gate
        d = conv3x3(wd_ref)                                               # (NBC, HW)

        # ---- pointwise 1x1 across channels (block-diag over images, one MXU
        #      matmul for the whole slab) + residual; lane-dense store.
        r = jnp.dot(wpb_ref[...], d, preferred_element_type=jnp.float32)  # (NBC, HW)
        out_ref[...] = (x + r).astype(out_ref.dtype)

    return kernel


@functools.partial(jax.jit, static_argnames=())
def localized_refinement(x, w_gate, w_dw, w_pw):
    """x: (N, C, H, W); w_gate: (1, C, 3, 3); w_dw: (C, 1, 3, 3); w_pw: (C, C, 1, 1)."""
    N, C, H, W = x.shape
    KS = w_gate.shape[-1]
    HW = H * W
    PAD = 128
    assert W + 1 <= PAD, "PAD must cover one full row shift"
    assert HW % 128 == 0, "flattened image must be lane-aligned (H*W % 128 == 0)"
    # NOTE: for much larger H*W, tile the HW (lane) axis in the BlockSpec instead
    # of growing the padded scratch; not needed at these shapes.

    NB = _pick_images_per_step(N, C)
    NBC = NB * C
    steps = N // NB

    wg = w_gate.reshape(C, KS * KS).astype(jnp.float32)        # [c, ky*3+kx]
    wd = w_dw.reshape(C, KS * KS).astype(jnp.float32)          # [c, ky*3+kx]
    wp = w_pw.reshape(C, C).astype(jnp.float32)                # [c_out, c_in]

    # Per-row (image-tiled) tap weights and per-image block-diagonal matrices.
    wg_t = jnp.tile(wg, (NB, 1))                               # (NBC, 9)
    wd_t = jnp.tile(wd, (NB, 1))                               # (NBC, 9)
    eye_nb = jnp.eye(NB, dtype=jnp.float32)
    bsum = jnp.kron(eye_nb, jnp.ones((C, C), jnp.float32))     # (NBC, NBC)
    wpb = jnp.kron(eye_nb, wp)                                 # (NBC, NBC)

    # Precomputed 0/1 horizontal-validity masks (row 0: dx=-1, row 1: dx=+1).
    col = jnp.arange(HW, dtype=jnp.int32) % W
    mask = jnp.stack([col > 0, col < (W - 1)]).astype(jnp.float32)   # (2, HW)

    xf = x.reshape(N * C, HW)                                  # free reinterpret of NCHW

    cost = pl.CostEstimate(
        flops=int(N * (2 * 2 * 9 * C * HW + 2 * C * C * HW)),
        transcendentals=int(N * HW),
        bytes_accessed=int(2 * N * C * HW * 4),
    )

    out_flat = pl.pallas_call(
        _make_kernel(W, HW, PAD, NBC),
        out_shape=jax.ShapeDtypeStruct((N * C, HW), x.dtype),
        grid=(steps,),
        in_specs=[
            pl.BlockSpec((2, HW), lambda i: (0, 0)),           # dx masks
            pl.BlockSpec((NBC, KS * KS), lambda i: (0, 0)),    # gate weights (tiled)
            pl.BlockSpec((NBC, KS * KS), lambda i: (0, 0)),    # depthwise weights (tiled)
            pl.BlockSpec((NBC, NBC), lambda i: (0, 0)),        # block-diag channel-sum
            pl.BlockSpec((NBC, NBC), lambda i: (0, 0)),        # block-diag pointwise
            pl.BlockSpec((NBC, HW), lambda i: (i, 0)),         # NB input images
        ],
        out_specs=pl.BlockSpec((NBC, HW), lambda i: (i, 0)),
        scratch_shapes=[pltpu.VMEM((NBC, PAD + HW + PAD), jnp.float32)],
        compiler_params=pltpu.CompilerParams(dimension_semantics=("parallel",)),
        cost_estimate=cost,
    )(mask, wg_t, wd_t, bsum, wpb, xf)
    return out_flat.reshape(N, C, H, W)


def reference(x, w_gate, w_dw, w_pw):
    """Pure-JAX reference matching the PyTorch module exactly (all convs bias-free)."""
    dn = ("NCHW", "OIHW", "NCHW")
    C = x.shape[1]
    prec = lax.Precision.HIGHEST
    importance = jax.nn.sigmoid(
        lax.conv_general_dilated(x, w_gate, (1, 1), "SAME",
                                 dimension_numbers=dn, precision=prec))
    y = x * importance
    d = lax.conv_general_dilated(y, w_dw, (1, 1), "SAME", dimension_numbers=dn,
                                 feature_group_count=C, precision=prec)
    r = lax.conv_general_dilated(d, w_pw, (1, 1), "SAME",
                                 dimension_numbers=dn, precision=prec)
    return x + r


if __name__ == "__main__":
    N, C, H, W = 2, 4, 16, 16
    key = jax.random.PRNGKey(0)
    k1, k2, k3, k4 = jax.random.split(key, 4)

    x = jax.random.normal(k1, (N, C, H, W), jnp.float32)
    # Module weight shapes: gate (1,C,3,3), depthwise (C,1,3,3), pointwise (C,C,1,1).
    w_gate = jax.random.normal(k2, (1, C, 3, 3), jnp.float32) * 0.2
    w_dw = jax.random.normal(k3, (C, 1, 3, 3), jnp.float32) * 0.2
    w_pw = jax.random.normal(k4, (C, C, 1, 1), jnp.float32) * 0.2

    out = jax.block_until_ready(localized_refinement(x, w_gate, w_dw, w_pw))
    ref = jax.block_until_ready(reference(x, w_gate, w_dw, w_pw))
    # Default-precision MXU matmuls in the kernel (review recommendation) shift
    # numerics slightly vs. the HIGHEST-precision reference; 2e-3 covers it.
    np.testing.assert_allclose(np.asarray(out), np.asarray(ref), rtol=2e-3, atol=2e-3)
    print("KERNEL_OK")
</pallas_src>

<mosaic_0001>
module attributes {stable_mosaic.version = 11 : i64} {
  func.func @kernel(%arg0: i32, %arg1: memref<2x256xf32, #tpu.memory_space<vmem>>, %arg2: memref<8x9xf32, #tpu.memory_space<vmem>>, %arg3: memref<8x9xf32, #tpu.memory_space<vmem>>, %arg4: memref<8x8xf32, #tpu.memory_space<vmem>>, %arg5: memref<8x8xf32, #tpu.memory_space<vmem>>, %arg6: memref<8x256xf32, #tpu.memory_space<vmem>>, %arg7: memref<8x256xf32, #tpu.memory_space<vmem>>, %arg8: memref<8x512xf32, #tpu.memory_space<vmem>>) attributes {dimension_semantics = [#tpu.dimension_semantics<parallel>], iteration_bounds = array<i64: 1>, scalar_prefetch = 0 : i64, scratch_operands = 1 : i64, tpu.core_type = #tpu.core_type<tc>, window_params = [{pipeline_mode = #tpu.pipeline_mode<synchronous>, transform_indices = @transform_0, window_bounds = array<i64: 2, 256>}, {pipeline_mode = #tpu.pipeline_mode<synchronous>, transform_indices = @transform_1, window_bounds = array<i64: 8, 9>}, {pipeline_mode = #tpu.pipeline_mode<synchronous>, transform_indices = @transform_2, window_bounds = array<i64: 8, 9>}, {pipeline_mode = #tpu.pipeline_mode<synchronous>, transform_indices = @transform_3, window_bounds = array<i64: 8, 8>}, {pipeline_mode = #tpu.pipeline_mode<synchronous>, transform_indices = @transform_4, window_bounds = array<i64: 8, 8>}, {transform_indices = @transform_5, window_bounds = array<i64: 8, 256>}, {transform_indices = @transform_6, window_bounds = array<i64: 8, 256>}]} {
    %c0 = arith.constant 0 : index
    %c0_0 = arith.constant 0 : index
    %0 = vector.load %arg6[%c0, %c0_0] : memref<8x256xf32, #tpu.memory_space<vmem>>, vector<8x256xf32>
    %c0_1 = arith.constant 0 : index
    %c0_2 = arith.constant 0 : index
    %1 = vector.load %arg1[%c0_1, %c0_2] : memref<2x256xf32, #tpu.memory_space<vmem>>, vector<1x256xf32>
    %c1 = arith.constant 1 : index
    %c0_3 = arith.constant 0 : index
    %2 = vector.load %arg1[%c1, %c0_3] : memref<2x256xf32, #tpu.memory_space<vmem>>, vector<1x256xf32>
    %cst = arith.constant 0.000000e+00 : f32
    %3 = vector.broadcast %cst : f32 to vector<8x128xf32>
    %c0_4 = arith.constant 0 : index
    %c0_5 = arith.constant 0 : index
    %4 = vector.load %arg8[%c0_4, %c0_5] : memref<8x512xf32, #tpu.memory_space<vmem>>, vector<8x128xf32>
    tpu.vector_store %arg8[%c0_4, %c0_5], %3 {strides = array<i32>} : memref<8x512xf32, #tpu.memory_space<vmem>>, vector<8x128xf32>,
    %c0_6 = arith.constant 0 : index
    %c384 = arith.constant 384 : index
    %5 = vector.load %arg8[%c0_6, %c384] : memref<8x512xf32, #tpu.memory_space<vmem>>, vector<8x128xf32>
    tpu.vector_store %arg8[%c0_6, %c384], %3 {strides = array<i32>} : memref<8x512xf32, #tpu.memory_space<vmem>>, vector<8x128xf32>,
    %c0_7 = arith.constant 0 : index
    %c128 = arith.constant 128 : index
    %6 = vector.load %arg8[%c0_7, %c128] : memref<8x512xf32, #tpu.memory_space<vmem>>, vector<8x256xf32>
    tpu.vector_store %arg8[%c0_7, %c128], %0 {strides = array<i32>} : memref<8x512xf32, #tpu.memory_space<vmem>>, vector<8x256xf32>,
    %c0_8 = arith.constant 0 : index
    %c0_9 = arith.constant 0 : index
    %7 = vector.load %arg8[%c0_8, %c0_9] : memref<8x512xf32, #tpu.memory_space<vmem>>, vector<8x512xf32>
    %8 = vector.extract_strided_slice %7 {offsets = [0, 112], sizes = [8, 256], strides = [1, 1]} : vector<8x512xf32> to vector<8x256xf32>
    %c0_10 = arith.constant 0 : index
    %c1_11 = arith.constant 1 : index
    %9 = vector.load %arg2[%c0_10, %c1_11] : memref<8x9xf32, #tpu.memory_space<vmem>>, vector<8x1xf32>
    %10 = vector.broadcast %9 : vector<8x1xf32> to vector<8x256xf32>
    %11 = arith.mulf %8, %10 : vector<8x256xf32>
    %12 = vector.extract_strided_slice %7 {offsets = [0, 128], sizes = [8, 256], strides = [1, 1]} : vector<8x512xf32> to vector<8x256xf32>
    %c0_12 = arith.constant 0 : index
    %c4 = arith.constant 4 : index
    %13 = vector.load %arg2[%c0_12, %c4] : memref<8x9xf32, #tpu.memory_space<vmem>>, vector<8x1xf32>
    %14 = vector.broadcast %13 : vector<8x1xf32> to vector<8x256xf32>
    %15 = arith.mulf %12, %14 : vector<8x256xf32>
    %16 = arith.addf %11, %15 : vector<8x256xf32>
    %17 = vector.extract_strided_slice %7 {offsets = [0, 144], sizes = [8, 256], strides = [1, 1]} : vector<8x512xf32> to vector<8x256xf32>
    %c0_13 = arith.constant 0 : index
    %c7 = arith.constant 7 : index
    %18 = vector.load %arg2[%c0_13, %c7] : memref<8x9xf32, #tpu.memory_space<vmem>>, vector<8x1xf32>
    %19 = vector.broadcast %18 : vector<8x1xf32> to vector<8x256xf32>
    %20 = arith.mulf %17, %19 : vector<8x256xf32>
    %21 = arith.addf %16, %20 : vector<8x256xf32>
    %22 = vector.extract_strided_slice %7 {offsets = [0, 111], sizes = [8, 256], strides = [1, 1]} : vector<8x512xf32> to vector<8x256xf32>
    %c0_14 = arith.constant 0 : index
    %c0_15 = arith.constant 0 : index
    %23 = vector.load %arg2[%c0_14, %c0_15] : memref<8x9xf32, #tpu.memory_space<vmem>>, vector<8x1xf32>
    %24 = vector.broadcast %23 : vector<8x1xf32> to vector<8x256xf32>
    %25 = arith.mulf %22, %24 : vector<8x256xf32>
    %26 = vector.extract_strided_slice %7 {offsets = [0, 127], sizes = [8, 256], strides = [1, 1]} : vector<8x512xf32> to vector<8x256xf32>
    %c0_16 = arith.constant 0 : index
    %c3 = arith.constant 3 : index
    %27 = vector.load %arg2[%c0_16, %c3] : memref<8x9xf32, #tpu.memory_space<vmem>>, vector<8x1xf32>
    %28 = vector.broadcast %27 : vector<8x1xf32> to vector<8x256xf32>
    %29 = arith.mulf %26, %28 : vector<8x256xf32>
    %30 = arith.addf %25, %29 : vector<8x256xf32>
    %31 = vector.extract_strided_slice %7 {offsets = [0, 143], sizes = [8, 256], strides = [1, 1]} : vector<8x512xf32> to vector<8x256xf32>
    %c0_17 = arith.constant 0 : index
    %c6 = arith.constant 6 : index
    %32 = vector.load %arg2[%c0_17, %c6] : memref<8x9xf32, #tpu.memory_space<vmem>>, vector<8x1xf32>
    %33 = vector.broadcast %32 : vector<8x1xf32> to vector<8x256xf32>
    %34 = arith.mulf %31, %33 : vector<8x256xf32>
    %35 = arith.addf %30, %34 : vector<8x256xf32>
    %36 = vector.broadcast %1 : vector<1x256xf32> to vector<8x256xf32>
    %37 = arith.mulf %36, %35 : vector<8x256xf32>
    %38 = arith.addf %21, %37 : vector<8x256xf32>
    %39 = vector.extract_strided_slice %7 {offsets = [0, 113], sizes = [8, 256], strides = [1, 1]} : vector<8x512xf32> to vector<8x256xf32>
    %c0_18 = arith.constant 0 : index
    %c2 = arith.constant 2 : index
    %40 = vector.load %arg2[%c0_18, %c2] : memref<8x9xf32, #tpu.memory_space<vmem>>, vector<8x1xf32>
    %41 = vector.broadcast %40 : vector<8x1xf32> to vector<8x256xf32>
    %42 = arith.mulf %39, %41 : vector<8x256xf32>
    %43 = vector.extract_strided_slice %7 {offsets = [0, 129], sizes = [8, 256], strides = [1, 1]} : vector<8x512xf32> to vector<8x256xf32>
    %c0_19 = arith.constant 0 : index
    %c5 = arith.constant 5 : index
    %44 = vector.load %arg2[%c0_19, %c5] : memref<8x9xf32, #tpu.memory_space<vmem>>, vector<8x1xf32>
    %45 = vector.broadcast %44 : vector<8x1xf32> to vector<8x256xf32>
    %46 = arith.mulf %43, %45 : vector<8x256xf32>
    %47 = arith.addf %42, %46 : vector<8x256xf32>
    %48 = vector.extract_strided_slice %7 {offsets = [0, 145], sizes = [8, 256], strides = [1, 1]} : vector<8x512xf32> to vector<8x256xf32>
    %c0_20 = arith.constant 0 : index
    %c8 = arith.constant 8 : index
    %49 = vector.load %arg2[%c0_20, %c8] : memref<8x9xf32, #tpu.memory_space<vmem>>, vector<8x1xf32>
    %50 = vector.broadcast %49 : vector<8x1xf32> to vector<8x256xf32>
    %51 = arith.mulf %48, %50 : vector<8x256xf32>
    %52 = arith.addf %47, %51 : vector<8x256xf32>
    %53 = vector.broadcast %2 : vector<1x256xf32> to vector<8x256xf32>
    %54 = arith.mulf %53, %52 : vector<8x256xf32>
    %55 = arith.addf %38, %54 : vector<8x256xf32>
    %c0_21 = arith.constant 0 : index
    %c0_22 = arith.constant 0 : index
    %56 = vector.load %arg4[%c0_21, %c0_22] : memref<8x8xf32, #tpu.memory_space<vmem>>, vector<8x8xf32>
    %cst_23 = arith.constant dense<0.000000e+00> : vector<8x256xf32>
    %57 = tpu.matmul %56, %55, %cst_23 {dimension_numbers = #tpu.dot_dimension_numbers<[1], [0], [0], [1], [0, 0, 1, 1], [], []>} : vector<8x8xf32>, vector<8x256xf32>, vector<8x256xf32> -> vector<8x256xf32>
    %58 = arith.negf %57 : vector<8x256xf32>
    %59 = math.exp %58 : vector<8x256xf32>
    %cst_24 = arith.constant 1.000000e+00 : f32
    %60 = vector.broadcast %cst_24 : f32 to vector<8x256xf32>
    %61 = arith.addf %60, %59 : vector<8x256xf32>
    %62 = arith.divf %60, %61 : vector<8x256xf32>
    %63 = arith.mulf %0, %62 : vector<8x256xf32>
    %c0_25 = arith.constant 0 : index
    %c128_26 = arith.constant 128 : index
    %64 = vector.load %arg8[%c0_25, %c128_26] : memref<8x512xf32, #tpu.memory_space<vmem>>, vector<8x256xf32>
    tpu.vector_store %arg8[%c0_25, %c128_26], %63 {strides = array<i32>} : memref<8x512xf32, #tpu.memory_space<vmem>>, vector<8x256xf32>,
    %c0_27 = arith.constant 0 : index
    %c0_28 = arith.constant 0 : index
    %65 = vector.load %arg8[%c0_27, %c0_28] : memref<8x512xf32, #tpu.memory_space<vmem>>, vector<8x512xf32>
    %66 = vector.extract_strided_slice %65 {offsets = [0, 112], sizes = [8, 256], strides = [1, 1]} : vector<8x512xf32> to vector<8x256xf32>
    %c0_29 = arith.constant 0 : index
    %c1_30 = arith.constant 1 : index
    %67 = vector.load %arg3[%c0_29, %c1_30] : memref<8x9xf32, #tpu.memory_space<vmem>>, vector<8x1xf32>
    %68 = vector.broadcast %67 : vector<8x1xf32> to vector<8x256xf32>
    %69 = arith.mulf %66, %68 : vector<8x256xf32>
    %70 = vector.extract_strided_slice %65 {offsets = [0, 128], sizes = [8, 256], strides = [1, 1]} : vector<8x512xf32> to vector<8x256xf32>
    %c0_31 = arith.constant 0 : index
    %c4_32 = arith.constant 4 : index
    %71 = vector.load %arg3[%c0_31, %c4_32] : memref<8x9xf32, #tpu.memory_space<vmem>>, vector<8x1xf32>
    %72 = vector.broadcast %71 : vector<8x1xf32> to vector<8x256xf32>
    %73 = arith.mulf %70, %72 : vector<8x256xf32>
    %74 = arith.addf %69, %73 : vector<8x256xf32>
    %75 = vector.extract_strided_slice %65 {offsets = [0, 144], sizes = [8, 256], strides = [1, 1]} : vector<8x512xf32> to vector<8x256xf32>
    %c0_33 = arith.constant 0 : index
    %c7_34 = arith.constant 7 : index
    %76 = vector.load %arg3[%c0_33, %c7_34] : memref<8x9xf32, #tpu.memory_space<vmem>>, vector<8x1xf32>
    %77 = vector.broadcast %76 : vector<8x1xf32> to vector<8x256xf32>
    %78 = arith.mulf %75, %77 : vector<8x256xf32>
    %79 = arith.addf %74, %78 : vector<8x256xf32>
    %80 = vector.extract_strided_slice %65 {offsets = [0, 111], sizes = [8, 256], strides = [1, 1]} : vector<8x512xf32> to vector<8x256xf32>
    %c0_35 = arith.constant 0 : index
    %c0_36 = arith.constant 0 : index
    %81 = vector.load %arg3[%c0_35, %c0_36] : memref<8x9xf32, #tpu.memory_space<vmem>>, vector<8x1xf32>
    %82 = vector.broadcast %81 : vector<8x1xf32> to vector<8x256xf32>
    %83 = arith.mulf %80, %82 : vector<8x256xf32>
    %84 = vector.extract_strided_slice %65 {offsets = [0, 127], sizes = [8, 256], strides = [1, 1]} : vector<8x512xf32> to vector<8x256xf32>
    %c0_37 = arith.constant 0 : index
    %c3_38 = arith.constant 3 : index
    %85 = vector.load %arg3[%c0_37, %c3_38] : memref<8x9xf32, #tpu.memory_space<vmem>>, vector<8x1xf32>
    %86 = vector.broadcast %85 : vector<8x1xf32> to vector<8x256xf32>
    %87 = arith.mulf %84, %86 : vector<8x256xf32>
    %88 = arith.addf %83, %87 : vector<8x256xf32>
    %89 = vector.extract_strided_slice %65 {offsets = [0, 143], sizes = [8, 256], strides = [1, 1]} : vector<8x512xf32> to vector<8x256xf32>
    %c0_39 = arith.constant 0 : index
    %c6_40 = arith.constant 6 : index
    %90 = vector.load %arg3[%c0_39, %c6_40] : memref<8x9xf32, #tpu.memory_space<vmem>>, vector<8x1xf32>
    %91 = vector.broadcast %90 : vector<8x1xf32> to vector<8x256xf32>
    %92 = arith.mulf %89, %91 : vector<8x256xf32>
    %93 = arith.addf %88, %92 : vector<8x256xf32>
    %94 = vector.broadcast %1 : vector<1x256xf32> to vector<8x256xf32>
    %95 = arith.mulf %94, %93 : vector<8x256xf32>
    %96 = arith.addf %79, %95 : vector<8x256xf32>
    %97 = vector.extract_strided_slice %65 {offsets = [0, 113], sizes = [8, 256], strides = [1, 1]} : vector<8x512xf32> to vector<8x256xf32>
    %c0_41 = arith.constant 0 : index
    %c2_42 = arith.constant 2 : index
    %98 = vector.load %arg3[%c0_41, %c2_42] : memref<8x9xf32, #tpu.memory_space<vmem>>, vector<8x1xf32>
    %99 = vector.broadcast %98 : vector<8x1xf32> to vector<8x256xf32>
    %100 = arith.mulf %97, %99 : vector<8x256xf32>
    %101 = vector.extract_strided_slice %65 {offsets = [0, 129], sizes = [8, 256], strides = [1, 1]} : vector<8x512xf32> to vector<8x256xf32>
    %c0_43 = arith.constant 0 : index
    %c5_44 = arith.constant 5 : index
    %102 = vector.load %arg3[%c0_43, %c5_44] : memref<8x9xf32, #tpu.memory_space<vmem>>, vector<8x1xf32>
    %103 = vector.broadcast %102 : vector<8x1xf32> to vector<8x256xf32>
    %104 = arith.mulf %101, %103 : vector<8x256xf32>
    %105 = arith.addf %100, %104 : vector<8x256xf32>
    %106 = vector.extract_strided_slice %65 {offsets = [0, 145], sizes = [8, 256], strides = [1, 1]} : vector<8x512xf32> to vector<8x256xf32>
    %c0_45 = arith.constant 0 : index
    %c8_46 = arith.constant 8 : index
    %107 = vector.load %arg3[%c0_45, %c8_46] : memref<8x9xf32, #tpu.memory_space<vmem>>, vector<8x1xf32>
    %108 = vector.broadcast %107 : vector<8x1xf32> to vector<8x256xf32>
    %109 = arith.mulf %106, %108 : vector<8x256xf32>
    %110 = arith.addf %105, %109 : vector<8x256xf32>
    %111 = vector.broadcast %2 : vector<1x256xf32> to vector<8x256xf32>
    %112 = arith.mulf %111, %110 : vector<8x256xf32>
    %113 = arith.addf %96, %112 : vector<8x256xf32>
    %c0_47 = arith.constant 0 : index
    %c0_48 = arith.constant 0 : index
    %114 = vector.load %arg5[%c0_47, %c0_48] : memref<8x8xf32, #tpu.memory_space<vmem>>, vector<8x8xf32>
    %cst_49 = arith.constant dense<0.000000e+00> : vector<8x256xf32>
    %115 = tpu.matmul %114, %113, %cst_49 {dimension_numbers = #tpu.dot_dimension_numbers<[1], [0], [0], [1], [0, 0, 1, 1], [], []>} : vector<8x8xf32>, vector<8x256xf32>, vector<8x256xf32> -> vector<8x256xf32>
    %116 = arith.addf %0, %115 : vector<8x256xf32>
    %c0_50 = arith.constant 0 : index
    %c0_51 = arith.constant 0 : index
    %117 = vector.load %arg7[%c0_50, %c0_51] : memref<8x256xf32, #tpu.memory_space<vmem>>, vector<8x256xf32>
    tpu.vector_store %arg7[%c0_50, %c0_51], %116 {strides = array<i32>} : memref<8x256xf32, #tpu.memory_space<vmem>>, vector<8x256xf32>,
    return
  }
  func.func @transform_0(%arg0: i32) -> (i32, i32) {
    %c0_i32 = arith.constant 0 : i32
    %c0_i32_0 = arith.constant 0 : i32
    %c0_i32_1 = arith.constant 0 : i32
    return %c0_i32, %c0_i32_0 : i32, i32
  }
  func.func @transform_1(%arg0: i32) -> (i32, i32) {
    %c0_i32 = arith.constant 0 : i32
    %c0_i32_0 = arith.constant 0 : i32
    %c0_i32_1 = arith.constant 0 : i32
    return %c0_i32, %c0_i32_0 : i32, i32
  }
  func.func @transform_2(%arg0: i32) -> (i32, i32) {
    %c0_i32 = arith.constant 0 : i32
    %c0_i32_0 = arith.constant 0 : i32
    %c0_i32_1 = arith.constant 0 : i32
    return %c0_i32, %c0_i32_0 : i32, i32
  }
  func.func @transform_3(%arg0: i32) -> (i32, i32) {
    %c0_i32 = arith.constant 0 : i32
    %c0_i32_0 = arith.constant 0 : i32
    %c0_i32_1 = arith.constant 0 : i32
    return %c0_i32, %c0_i32_0 : i32, i32
  }
  func.func @transform_4(%arg0: i32) -> (i32, i32) {
    %c0_i32 = arith.constant 0 : i32
    %c0_i32_0 = arith.constant 0 : i32
    %c0_i32_1 = arith.constant 0 : i32
    return %c0_i32, %c0_i32_0 : i32, i32
  }
  func.func @transform_5(%arg0: i32) -> (i32, i32) {
    %c0_i32 = arith.constant 0 : i32
    %c0_i32_0 = arith.constant 0 : i32
    return %arg0, %c0_i32 : i32, i32
  }
  func.func @transform_6(%arg0: i32) -> (i32, i32) {
    %c0_i32 = arith.constant 0 : i32
    %c0_i32_0 = arith.constant 0 : i32
    return %arg0, %c0_i32 : i32, i32
  }
}

</mosaic_0001>

<bundles_post_ra>
// kernel: mul.22
= control target key start
LH: loop header
LB: loop body
LE: loop exit
PB: predicated region body
PF: predicated region fallthrough
CT: control target
= control target key end

     0   :  { %s34_s0 = inlined_call_operand.vmem [shape: f32[8,8], index: 0, kind: input, shape index: {}]   ;;  %s35_s1 = inlined_call_operand.vmem [shape: f32[8,8], index: 1, kind: input, shape index: {}]   ;;  %s36_s2 = inlined_call_operand.vmem [shape: f32[8,8], index: 2, kind: output, shape index: {}]  }
   0x1   :  { %v3_v0 = vld [vmem:[%s34_s0] sm:$0xff] }
   0x2   :  { %v4_v1 = vld [vmem:[%s35_s1] sm:$0xff] }
   0x3   :  { %v7_v2 = vmul.f32 %v4_v1, %v3_v0 }
   0x5   :  { %9 = vst [vmem:[%s36_s2] sm:$0xff] %v7_v2 }

// kernel: localized_refinement.1
= control target key start
LH: loop header
LB: loop body
LE: loop exit
PB: predicated region body
PF: predicated region fallthrough
CT: control target
= control target key end

     0   :  { %v751_v0 = vmov 3   ;;  %v752_v2 = vmov 5   ;;  %v753_v3 = vmov 6   ;;  %v754_v4 = vmov 8   ;;  %s759_s26 = smov 112   ;;  %s760_s27 = smov 96   ;;  %s1034_s1 = inlined_call_operand.vmem [shape: f32[8,9], index: 1, kind: input, shape index: {}]   ;;  %s1035_s5 = inlined_call_operand.vmem [shape: f32[8,256], index: 5, kind: input, shape index: {}]   ;;  %s1036_s0 = inlined_call_operand.vmem [shape: f32[2,256], index: 0, kind: input, shape index: {}]   ;;  %s1037_s2 = inlined_call_operand.vmem [shape: f32[8,9], index: 2, kind: input, shape index: {}]   ;;  %s1038_s3 = inlined_call_operand.vmem [shape: f32[8,8], index: 3, kind: input, shape index: {}]   ;;  %s1039_s4 = inlined_call_operand.vmem [shape: f32[8,8], index: 4, kind: input, shape index: {}]   ;;  %s1040_s6 = inlined_call_operand.vmem [shape: f32[8,256], index: 6, kind: output, shape index: {}]  }
   0x1   :  { %724 = vset.pattern.permute.xlu0 %v751_v0  ;;  %v804_v1 = vld [vmem:[%s1034_s1] sm:$0xff]  ;;  %726 = vset.pattern.permute.xlu1 %v752_v2  ;;  %v755_v5 = vmov 0   ;;  %v756_v6 = vmov 2   ;;  %v757_v7 = vmov 4   ;;  %v758_v8 = vmov 7   ;;  %v822_v9 = vld [vmem:[%s1035_s5 + $0x8] sm:$0xff] }
   0x2   :  { %98 = vperm.xlu0 %724, %v804_v1   ;;  %193 = vperm.xlu1 %726, %v804_v1   ;;  %v828_v13 = vld [vmem:[%s1035_s5] sm:$0xff]  ;;  %v761_v27 = vmov 1   ;;  %vm57_vm0 = vcmask 916480   ;;  %vm81_vm1 = vcmask 785408   ;;  %s762_s5 = smov 17   ;;  %s763_s28 = smov 15  }
   0x3   :  { %vm165_vm2 = vcmask 138240   ;;  %vm260_vm3 = vcmask 121856   ;;  %vm290_vm4 = vcmask 130048   ;;  %vm295_vm5 = vcmask 64512  }
   0x6   :  { %725 = vset.pattern.permute.xlu0 %v753_v3  ;;  %727 = vset.pattern.permute.xlu1 %v754_v4 }
   0x7   :  { %122 = vperm.xlu0 %725, %v804_v1   ;;  %217 = vperm.xlu1 %727, %v804_v1  }
   0xb   :  { %728 = vset.pattern.permute.xlu1 %v755_v5  ;;  %729 = vset.pattern.permute.xlu0 %v756_v6 }
   0xc   :  { %91 = vperm.xlu1 %728, %v804_v1   ;;  %186 = vperm.xlu0 %729, %v804_v1  }
  0x10   :  { %730 = vset.pattern.permute.xlu0 %v757_v7  ;;  %731 = vset.pattern.permute.xlu1 %v758_v8 }
  0x81   :  { %v99_v10 = vpop.permute.xlu0 %98  ;;  %v194_v16 = vpop.permute.xlu1 %193 }
  0x82   :  { %v101_v11 = vmul.f32 0.0, %v99_v10  ;;  %v103_v12 = vmul.f32 %v99_v10, %v822_v9  ;;  %v102_v14 = vmul.f32 %v99_v10, %v828_v13  ;;  %v196_v19 = vmul.f32 %v194_v16, %v828_v13 }
  0x83   :  { %v198_v20 = vmul.f32 0.0, %v194_v16  ;;  %v197_v23 = vmul.f32 %v194_v16, %v822_v9 }
  0x84   :  { %111 = vrot.lane.b32.xlu0 %v103_v12, %s759_s26  ;;  %107 = vrot.lane.b32.xlu1 %v101_v11, %s759_s26 }
  0x86   :  { %v123_v15 = vpop.permute.xlu0 %122  ;;  %v218_v22 = vpop.permute.xlu1 %217 }
  0x87   :  { %v126_v17 = vmul.f32 %v123_v15, %v822_v9  ;;  %v125_v18 = vmul.f32 %v123_v15, %v828_v13  ;;  %v127_v21 = vmul.f32 0.0, %v123_v15  ;;  %v221_v24 = vmul.f32 %v218_v22, %v822_v9 }
  0x88   :  { %109 = vrot.lane.b32.xlu1 %v102_v14, %s759_s26  ;;  %v220_v25 = vmul.f32 %v218_v22, %v828_v13  ;;  %v222_v26 = vmul.f32 0.0, %v218_v22 }
  0x89   :  { %133 = vrot.lane.b32.xlu0 %v126_v17, %s760_s27 }
  0x8b   :  { %v92_v28 = vpop.permute.xlu1 %91  ;;  %v187_v29 = vpop.permute.xlu0 %186 }
  0x8c   :  { %131 = vrot.lane.b32.xlu1 %v125_v18, %s760_s27  ;;  %v96_v36 = vmul.f32 %v92_v28, %v822_v9  ;;  %v94_v38 = vmul.f32 0.0, %v92_v28  ;;  %v189_v45 = vmul.f32 0.0, %v187_v29  ;;  %v190_v48 = vmul.f32 %v187_v29, %v828_v13 }
  0x8d   :  { %202 = vrot.lane.b32.xlu0 %v196_v19, %s759_s26  ;;  %v95_v55 = vmul.f32 %v92_v28, %v828_v13  ;;  %v191_v63 = vmul.f32 %v187_v29, %v822_v9 }
  0x90   :  { %135 = vrot.lane.b32.xlu1 %v127_v21, %s760_s27 }
  0x91   :  { %206 = vrot.lane.b32.xlu0 %v198_v20, %s759_s26 }
  0x94   :  { %204 = vrot.lane.b32.xlu1 %v197_v23, %s759_s26 }
  0x95   :  { %228 = vrot.lane.b32.xlu0 %v221_v24, %s760_s27  ;;  %v25_v24 = vld [vmem:[%s1036_s0] ss:$2 sm:$0x3] }
  0x98   :  { %226 = vrot.lane.b32.xlu1 %v220_v25, %s760_s27 }
  0x99   :  { %46 = vperm.xlu0 %730, %v804_v1  }
  0x9c   :  { %230 = vrot.lane.b32.xlu1 %v222_v26, %s760_s27 }
  0x9d   :  { %733 = vset.pattern.permute.xlu0 %v751_v0 }
  0xa0   :  { %66 = vperm.xlu1 %731, %v804_v1  }
  0xa4   :  { %732 = vset.pattern.permute.xlu1 %v761_v27 }
  0xf6   :  { %v108_v30 = vpop.permute.xlu1 %107  ;;  %v112_v31 = vpop.permute.xlu0 %111 }
  0xf7   :  { %v120_v39 = vadd.f32 %v112_v31, %v96_v36 }
  0xfa   :  { %v110_v32 = vpop.permute.xlu1 %109 }
  0xfb   :  { %v134_v33 = vpop.permute.xlu0 %133  ;;  %v113_v37 = vsel %vm57_vm0, %v108_v30, %v110_v32  ;;  %v114_v52 = vsel %vm57_vm0, %v110_v32, %v112_v31  ;;  %v704_v30 = vld [vmem:[%s1036_s0 + $0x1] ss:$2 sm:$0x3]  ;;  %s765_s0 = smov 16  }
  0xfc   :  { %v118_v43 = vadd.f32 %v113_v37, %v94_v38  ;;  %v119_v60 = vadd.f32 %v114_v52, %v95_v55 }
  0xfe   :  { %v132_v34 = vpop.permute.xlu1 %131 }
  0xff   :  { %v203_v35 = vpop.permute.xlu0 %202  ;;  %v142_v49 = vadd.f32 %v132_v34, %v118_v43  ;;  %v137_v58 = vsel %vm81_vm1, %v132_v34, %v134_v33 }
 0x100   :  { %v213_v51 = vadd.f32 %v203_v35, %v189_v45  ;;  %v143_v0 = vadd.f32 %v137_v58, %v119_v60  ;;  %v764_v60 = vmov 0.0  }
 0x101   :  { %363 = vmatprep.mubr.f32.mxu0 %v764_v60  ;;  %689 = vmatprep.mubr.f32.mxu1 %v764_v60 }
 0x102   :  { %v136_v40 = vpop.permute.xlu1 %135 }
 0x103   :  { %v138_v41 = vsel %vm81_vm1, %v134_v33, %v136_v40  ;;  %v207_v42 = vpop.permute.xlu0 %206 }
 0x104   :  { %v144_v44 = vadd.f32 %v138_v41, %v120_v39 }
 0x106   :  { %v205_v46 = vpop.permute.xlu1 %204  ;;  %163 = vrot.lane.b32.xlu1 %v144_v44, %s762_s5 }
 0x107   :  { %v208_v47 = vsel %vm57_vm0, %v203_v35, %v205_v46  ;;  %v229_v50 = vpop.permute.xlu0 %228  ;;  %v209_v61 = vsel %vm57_vm0, %v205_v46, %v207_v42 }
 0x108   :  { %v214_v53 = vadd.f32 %v208_v47, %v190_v48  ;;  %v215_v11 = vadd.f32 %v209_v61, %v191_v63 }
 0x10a   :  { %v227_v54 = vpop.permute.xlu1 %226  ;;  %159 = vrot.lane.b32.xlu1 %v142_v49, %s762_s5 }
 0x10b   :  { %v237_v56 = vadd.f32 %v227_v54, %v213_v51  ;;  %v232_v57 = vsel %vm81_vm1, %v227_v54, %v229_v50 }
 0x10c   :  { %v238_v59 = vadd.f32 %v232_v57, %v214_v53 }
 0x10d   :  { %254 = vrot.lane.b32.xlu0 %v237_v56, %s763_s28 }
 0x10e   :  { %v231_v62 = vpop.permute.xlu1 %230  ;;  %256 = vrot.lane.b32.xlu1 %v238_v59, %s763_s28 }
 0x10f   :  { %v233_v10 = vsel %vm81_vm1, %v229_v50, %v231_v62 }
 0x110   :  { %v239_v12 = vadd.f32 %v233_v10, %v215_v11 }
 0x111   :  { %161 = vrot.lane.b32.xlu0 %v143_v0, %s762_s5 }
 0x112   :  { %39 = vperm.xlu1 %732, %v804_v1  }
 0x115   :  { %258 = vrot.lane.b32.xlu0 %v239_v12, %s763_s28 }
 0x116   :  { %734 = vset.pattern.permute.xlu1 %v753_v3  ;;  %v146_v3 = vlaneseq }
 0x118   :  { %v47_v14 = vpop.permute.xlu0 %46  ;;  %v147_v21 = vshrl.u32 %v146_v3, 7  ;;  %v919_v3 = vld [vmem:[%s1037_s2] sm:$0xff] }
 0x119   :  { %v49_v15 = vmul.f32 %v47_v14, %v828_v13  ;;  %v50_v16 = vmul.f32 %v47_v14, %v822_v9 }
 0x11a   :  { %v152_v23 = vsub.s32 1, %v147_v21  ;;  %v148_v26 = vsub.s32 0, %v147_v21 }
 0x11b   :  { %53 = vrot.lane.b32.xlu0 %v49_v15, %s759_s26  ;;  %55 = vrot.lane.b32.xlu1 %v50_v16, %s759_s26 }
 0x11c   :  { %v884_v28 = vrot.slane %v25_v24, %v148_v26  ;;  %v886_v29 = vrot.slane %v25_v24, %v152_v23  ;;  %v893_v35 = vrot.slane %v704_v30, %v148_v26  ;;  %v897_v38 = vrot.slane %v704_v30, %v152_v23 }
 0x11f   :  { %v67_v17 = vpop.permute.xlu1 %66 }
 0x120   :  { %v69_v18 = vmul.f32 %v67_v17, %v828_v13  ;;  %v70_v19 = vmul.f32 %v67_v17, %v822_v9  ;;  %v71_v1 = vmul.f32 0.0, %v67_v17 }
 0x122   :  { %75 = vrot.lane.b32.xlu0 %v69_v18, %s760_s27  ;;  %77 = vrot.lane.b32.xlu1 %v70_v19, %s760_s27 }
 0x126   :  { %79 = vrot.lane.b32.xlu0 %v71_v1, %s760_s27 }
 0x178   :  { %v164_v20 = vpop.permute.xlu1 %163 }
 0x17c   :  { %v160_v22 = vpop.permute.xlu1 %159 }
 0x17f   :  { %v255_v25 = vpop.permute.xlu0 %254 }
 0x180   :  { %v257_v31 = vpop.permute.xlu1 %256 }
 0x181   :  { %v261_v39 = vsel %vm260_vm3, %v255_v25, %v257_v31 }
 0x182   :  { %v265_v42 = vmul.f32 %v261_v39, %v893_v35 }
 0x183   :  { %v162_v32 = vpop.permute.xlu0 %161 }
 0x184   :  { %v166_v33 = vsel %vm165_vm2, %v160_v22, %v162_v32  ;;  %v167_v34 = vsel %vm165_vm2, %v162_v32, %v164_v20 }
 0x185   :  { %v170_v36 = vmul.f32 %v166_v33, %v884_v28  ;;  %v171_v37 = vmul.f32 %v167_v34, %v886_v29 }
 0x187   :  { %v259_v40 = vpop.permute.xlu0 %258  ;;  %176 = vrot.lane.b32.xlu0 %v171_v37, %s759_s26  ;;  %174 = vrot.lane.b32.xlu1 %v170_v36, %s759_s26 }
 0x188   :  { %v262_v41 = vsel %vm260_vm3, %v257_v31, %v259_v40 }
 0x189   :  { %v266_v43 = vmul.f32 %v262_v41, %v897_v38 }
 0x18b   :  { %271 = vrot.lane.b32.xlu0 %v266_v43, %s759_s26  ;;  %269 = vrot.lane.b32.xlu1 %v265_v42, %s759_s26 }
 0x18d   :  { %v54_v45 = vpop.permute.xlu0 %53 }
 0x191   :  { %v40_v44 = vpop.permute.xlu1 %39 }
 0x192   :  { %v44_v48 = vmul.f32 %v40_v44, %v822_v9  ;;  %v43_v49 = vmul.f32 %v40_v44, %v828_v13  ;;  %v42_v54 = vmul.f32 0.0, %v40_v44 }
 0x194   :  { %v76_v47 = vpop.permute.xlu0 %75  ;;  %v62_v63 = vadd.f32 %v54_v45, %v42_v54 }
 0x195   :  { %v56_v46 = vpop.permute.xlu1 %55 }
 0x196   :  { %v58_v50 = vsel %vm57_vm0, %v54_v45, %v56_v46  ;;  %v64_v53 = vadd.f32 %v56_v46, %v44_v48  ;;  %v87_v17 = vadd.f32 %v76_v47, %v62_v63 }
 0x197   :  { %v63_v55 = vadd.f32 %v58_v50, %v43_v49 }
 0x198   :  { %v80_v52 = vpop.permute.xlu0 %79 }
 0x199   :  { %v78_v51 = vpop.permute.xlu1 %77 }
 0x19a   :  { %v83_v56 = vsel %vm81_vm1, %v78_v51, %v80_v52  ;;  %v82_v57 = vsel %vm81_vm1, %v76_v47, %v78_v51 }
 0x19b   :  { %v89_v61 = vadd.f32 %v83_v56, %v64_v53  ;;  %v88_v0 = vadd.f32 %v82_v57, %v63_v55 }
 0x1f9   :  { %v177_v58 = vpop.permute.xlu0 %176  ;;  %v175_v59 = vpop.permute.xlu1 %174 }
 0x1fa   :  { %v178_v62 = vsel %vm57_vm0, %v175_v59, %v177_v58  ;;  %v184_v10 = vadd.f32 %v177_v58, %v89_v61  ;;  %v182_v19 = vadd.f32 %v175_v59, %v87_v17 }
 0x1fb   :  { %v183_v11 = vadd.f32 %v178_v62, %v88_v0 }
 0x1fd   :  { %v272_v12 = vpop.permute.xlu0 %271  ;;  %v270_v14 = vpop.permute.xlu1 %269 }
 0x1fe   :  { %v279_v15 = vadd.f32 %v272_v12, %v184_v10  ;;  %v273_v16 = vsel %vm57_vm0, %v270_v14, %v272_v12  ;;  %v277_v1 = vadd.f32 %v270_v14, %v182_v19 }
 0x1ff   :  { %v278_v18 = vadd.f32 %v273_v16, %v183_v11 }
 0x200   :  { %288 = vrot.lane.b32.xlu0 %v279_v15, %s765_s0 }
 0x201   :  { %286 = vrot.lane.b32.xlu1 %v278_v18, %s765_s0 }
 0x204   :  { %450 = vperm.xlu0 %733, %v919_v3  }
 0x205   :  { %284 = vrot.lane.b32.xlu1 %v277_v1, %s765_s0 }
 0x208   :  { %736 = vset.pattern.permute.xlu0 %v754_v4 }
 0x209   :  { %474 = vperm.xlu1 %734, %v919_v3   ;;  %557 = vperm.xlu0 %736, %v919_v3  }
 0x20d   :  { %735 = vset.pattern.permute.xlu1 %v752_v2  ;;  %739 = vset.pattern.permute.xlu0 %v757_v7  ;;  %v280_v7 = vld [vmem:[%s1038_s3] sm:$0xff] }
 0x20e   :  { %533 = vperm.xlu1 %735, %v919_v3  }
 0x212   :  { %737 = vset.pattern.permute.xlu1 %v755_v5 }
 0x213   :  { %443 = vperm.xlu1 %737, %v919_v3  }
 0x217   :  { %738 = vset.pattern.permute.xlu1 %v756_v6 }
 0x218   :  { %526 = vperm.xlu1 %738, %v919_v3  }
 0x21c   :  { %740 = vset.pattern.permute.xlu1 %v758_v8 }
 0x272   :  { %v289_v20 = vpop.permute.xlu0 %288 }
 0x273   :  { %v287_v21 = vpop.permute.xlu1 %286 }
 0x274   :  { %v292_v22 = vsel %vm290_vm4, %v287_v21, %v289_v20 }
 0x275   :  { %299 = vmatprep.subr.mxu0 %v292_v22 }
 0x277   :  { %v285_v2 = vpop.permute.xlu1 %284 }
 0x278   :  { %v291_v5 = vsel %vm290_vm4, %v285_v2, %v287_v21 }
 0x279   :  { %300 = vmatpush1.msra.mxu0 %v291_v5 }
 0x27a   :  { %705 = vmatmul.mubr.msk.f32.vlgmr.msra.gmra.mrb[0].mxu0 %vm295_vm5, %v280_v7 }
 0x283   :  { %v451_v23 = vpop.permute.xlu0 %450 }
 0x284   :  { %v453_v8 = vmul.f32 0.0, %v451_v23 }
 0x286   :  { %459 = vrot.lane.b32.xlu0 %v453_v8, %s759_s26 }
 0x288   :  { %v475_v6 = vpop.permute.xlu1 %474  ;;  %v558_v48 = vpop.permute.xlu0 %557 }
 0x289   :  { %v479_v24 = vmul.f32 0.0, %v475_v6  ;;  %v562_v53 = vmul.f32 0.0, %v558_v48 }
 0x28b   :  { %487 = vrot.lane.b32.xlu1 %v479_v24, %s760_s27 }
 0x28d   :  { %v534_v25 = vpop.permute.xlu1 %533 }
 0x28e   :  { %v538_v26 = vmul.f32 0.0, %v534_v25 }
 0x290   :  { %546 = vrot.lane.b32.xlu0 %v538_v26, %s759_s26 }
 0x292   :  { %v444_v54 = vpop.permute.xlu1 %443 }
 0x293   :  { %v446_v59 = vmul.f32 0.0, %v444_v54 }
 0x297   :  { %v527_v56 = vpop.permute.xlu1 %526 }
 0x298   :  { %v529_v10 = vmul.f32 0.0, %v527_v56 }
 0x2f8   :  { %v460_v55 = vpop.permute.xlu0 %459 }
 0x2fd   :  { %v488_v57 = vpop.permute.xlu1 %487 }
 0x302   :  { %v547_v58 = vpop.permute.xlu0 %546 }
 0x34d   :  { %v365_v30 = vpop.f32.mrb[0].mxu0 }
 0x34e   :  { %v706_v31 = vmul.f32 -1.442695, %v365_v30  ;;  %v367_v32 = vpop.f32.mrb[1].mxu0 }
 0x34f   :  { %v707_v33 = vmul.f32 -1.442695, %v367_v32 }
 0x350   :  { %743 = vpow2.f32 %v706_v31 }
 0x351   :  { %745 = vpow2.f32 %v707_v33 }
 0x35a   :  { %v744_v34 = vpop.eup %743 }
 0x35b   :  { %v746_v36 = vpop.eup %745  ;;  %v376_v37 = vadd.f32 1.0, %v744_v34 }
 0x35c   :  { %v377_v39 = vadd.f32 1.0, %v746_v36 }
 0x35d   :  { %747 = vrcp.f32 %v376_v37 }
 0x35e   :  { %749 = vrcp.f32 %v377_v39 }
 0x367   :  { %v748_v40 = vpop.eup %747 }
 0x368   :  { %v750_v41 = vpop.eup %749  ;;  %v944_v42 = vmul.f32 %v748_v40, %v828_v13 }
 0x369   :  { %v949_v45 = vmul.f32 %v750_v41, %v822_v9 }
 0x36a   :  { %v454_v43 = vmul.f32 %v451_v23, %v944_v42  ;;  %v536_v44 = vmul.f32 %v534_v25, %v944_v42  ;;  %v477_v46 = vmul.f32 %v475_v6, %v944_v42  ;;  %v560_v49 = vmul.f32 %v558_v48, %v944_v42 }
 0x36b   :  { %v455_v47 = vmul.f32 %v451_v23, %v949_v45  ;;  %v478_v50 = vmul.f32 %v475_v6, %v949_v45  ;;  %v537_v51 = vmul.f32 %v534_v25, %v949_v45  ;;  %v561_v52 = vmul.f32 %v558_v48, %v949_v45 }
 0x36c   :  { %461 = vrot.lane.b32.xlu1 %v454_v43, %s759_s26  ;;  %542 = vrot.lane.b32.xlu0 %v536_v44, %s759_s26  ;;  %v448_v14 = vmul.f32 %v444_v54, %v949_v45  ;;  %v447_v16 = vmul.f32 %v444_v54, %v944_v42  ;;  %v530_v2 = vmul.f32 %v527_v56, %v944_v42 }
 0x36d   :  { %v531_v24 = vmul.f32 %v527_v56, %v949_v45 }
 0x370   :  { %483 = vrot.lane.b32.xlu1 %v477_v46, %s760_s27  ;;  %463 = vrot.lane.b32.xlu0 %v455_v47, %s759_s26 }
 0x374   :  { %566 = vrot.lane.b32.xlu1 %v560_v49, %s760_s27  ;;  %485 = vrot.lane.b32.xlu0 %v478_v50, %s760_s27 }
 0x378   :  { %544 = vrot.lane.b32.xlu1 %v537_v51, %s759_s26  ;;  %568 = vrot.lane.b32.xlu0 %v561_v52, %s760_s27 }
 0x37c   :  { %570 = vrot.lane.b32.xlu1 %v562_v53, %s760_s27  ;;  %400 = vperm.xlu0 %739, %v919_v3  }
 0x380   :  { %419 = vperm.xlu1 %740, %v919_v3   ;;  %742 = vset.pattern.permute.xlu0 %v754_v4 }
 0x384   :  { %741 = vset.pattern.permute.xlu1 %v761_v27 }
 0x3de   :  { %v462_v60 = vpop.permute.xlu1 %461  ;;  %v543_v61 = vpop.permute.xlu0 %542 }
 0x3df   :  { %v465_v62 = vsel %vm57_vm0, %v460_v55, %v462_v60  ;;  %v553_v4 = vadd.f32 %v543_v61, %v529_v10 }
 0x3e0   :  { %v470_v63 = vadd.f32 %v465_v62, %v446_v59 }
 0x3e2   :  { %v484_v0 = vpop.permute.xlu1 %483  ;;  %v464_v11 = vpop.permute.xlu0 %463 }
 0x3e3   :  { %v494_v12 = vadd.f32 %v484_v0, %v470_v63  ;;  %v466_v27 = vsel %vm57_vm0, %v462_v60, %v464_v11  ;;  %v472_v17 = vadd.f32 %v464_v11, %v448_v14 }
 0x3e4   :  { %v471_v21 = vadd.f32 %v466_v27, %v447_v16 }
 0x3e5   :  { %500 = vrot.lane.b32.xlu1 %v494_v12, %s762_s5 }
 0x3e6   :  { %v567_v15 = vpop.permute.xlu1 %566  ;;  %v486_v18 = vpop.permute.xlu0 %485 }
 0x3e7   :  { %v577_v19 = vadd.f32 %v567_v15, %v553_v4  ;;  %v489_v1 = vsel %vm81_vm1, %v484_v0, %v486_v18  ;;  %v490_v20 = vsel %vm81_vm1, %v486_v18, %v488_v57 }
 0x3e8   :  { %v496_v22 = vadd.f32 %v490_v20, %v472_v17  ;;  %v495_v5 = vadd.f32 %v489_v1, %v471_v21 }
 0x3e9   :  { %583 = vrot.lane.b32.xlu0 %v577_v19, %s763_s28 }
 0x3ea   :  { %v545_v7 = vpop.permute.xlu1 %544  ;;  %v569_v6 = vpop.permute.xlu0 %568  ;;  %504 = vrot.lane.b32.xlu1 %v496_v22, %s762_s5 }
 0x3eb   :  { %v548_v23 = vsel %vm57_vm0, %v543_v61, %v545_v7  ;;  %v549_v8 = vsel %vm57_vm0, %v545_v7, %v547_v58  ;;  %v572_v26 = vsel %vm81_vm1, %v567_v15, %v569_v6 }
 0x3ec   :  { %v554_v25 = vadd.f32 %v548_v23, %v530_v2  ;;  %v555_v30 = vadd.f32 %v549_v8, %v531_v24 }
 0x3ed   :  { %502 = vrot.lane.b32.xlu0 %v495_v5, %s762_s5 }
 0x3ee   :  { %v571_v31 = vpop.permute.xlu1 %570  ;;  %v578_v32 = vadd.f32 %v572_v26, %v554_v25  ;;  %v608_v25 = vld [vmem:[%s1039_s4] sm:$0xff] }
 0x3ef   :  { %v573_v33 = vsel %vm81_vm1, %v569_v6, %v571_v31 }
 0x3f0   :  { %v579_v34 = vadd.f32 %v573_v33, %v555_v30  ;;  %585 = vrot.lane.b32.xlu1 %v578_v32, %s763_s28 }
 0x3f2   :  { %587 = vrot.lane.b32.xlu0 %v579_v34, %s763_s28 }
 0x3f4   :  { %393 = vperm.xlu1 %741, %v919_v3  }
 0x3fb   :  { %v401_v36 = vpop.permute.xlu0 %400 }
 0x3fc   :  { %v403_v37 = vmul.f32 %v401_v36, %v944_v42  ;;  %v404_v39 = vmul.f32 %v401_v36, %v949_v45 }
 0x3fe   :  { %409 = vrot.lane.b32.xlu1 %v404_v39, %s759_s26  ;;  %407 = vrot.lane.b32.xlu0 %v403_v37, %s759_s26 }
 0x3ff   :  { %v420_v40 = vpop.permute.xlu1 %419 }
 0x400   :  { %v422_v41 = vmul.f32 %v420_v40, %v944_v42  ;;  %v423_v43 = vmul.f32 %v420_v40, %v949_v45  ;;  %v424_v44 = vmul.f32 0.0, %v420_v40 }
 0x402   :  { %430 = vrot.lane.b32.xlu1 %v423_v43, %s760_s27  ;;  %428 = vrot.lane.b32.xlu0 %v422_v41, %s760_s27 }
 0x406   :  { %432 = vrot.lane.b32.xlu0 %v424_v44, %s760_s27 }
 0x457   :  { %v501_v3 = vpop.permute.xlu1 %500 }
 0x45b   :  { %v584_v46 = vpop.permute.xlu0 %583 }
 0x45c   :  { %v505_v47 = vpop.permute.xlu1 %504 }
 0x45f   :  { %v503_v48 = vpop.permute.xlu0 %502 }
 0x460   :  { %v506_v49 = vsel %vm165_vm2, %v501_v3, %v503_v48  ;;  %v507_v50 = vsel %vm165_vm2, %v503_v48, %v505_v47 }
 0x461   :  { %v510_v51 = vmul.f32 %v506_v49, %v884_v28  ;;  %v511_v52 = vmul.f32 %v507_v50, %v886_v29 }
 0x462   :  { %v586_v53 = vpop.permute.xlu1 %585 }
 0x463   :  { %v589_v54 = vsel %vm260_vm3, %v584_v46, %v586_v53  ;;  %514 = vrot.lane.b32.xlu1 %v510_v51, %s759_s26  ;;  %516 = vrot.lane.b32.xlu0 %v511_v52, %s759_s26 }
 0x464   :  { %v593_v55 = vmul.f32 %v589_v54, %v893_v35  ;;  %v588_v56 = vpop.permute.xlu0 %587 }
 0x465   :  { %v590_v57 = vsel %vm260_vm3, %v586_v53, %v588_v56 }
 0x466   :  { %v594_v58 = vmul.f32 %v590_v57, %v897_v38 }
 0x467   :  { %597 = vrot.lane.b32.xlu1 %v593_v55, %s759_s26 }
 0x468   :  { %599 = vrot.lane.b32.xlu0 %v594_v58, %s759_s26 }
 0x470   :  { %v408_v29 = vpop.permute.xlu0 %407 }
 0x473   :  { %v394_v28 = vpop.permute.xlu1 %393 }
 0x474   :  { %v429_v60 = vpop.permute.xlu0 %428  ;;  %v398_v63 = vmul.f32 %v394_v28, %v949_v45  ;;  %v396_v35 = vmul.f32 0.0, %v394_v28  ;;  %v397_v10 = vmul.f32 %v394_v28, %v944_v42 }
 0x476   :  { %v415_v17 = vadd.f32 %v408_v29, %v396_v35 }
 0x477   :  { %v410_v59 = vpop.permute.xlu1 %409 }
 0x478   :  { %v433_v61 = vpop.permute.xlu0 %432  ;;  %v411_v0 = vsel %vm57_vm0, %v408_v29, %v410_v59  ;;  %v417_v38 = vadd.f32 %v410_v59, %v398_v63  ;;  %v439_v22 = vadd.f32 %v429_v60, %v415_v17 }
 0x479   :  { %v416_v27 = vadd.f32 %v411_v0, %v397_v10 }
 0x47b   :  { %v431_v62 = vpop.permute.xlu1 %430 }
 0x47c   :  { %v435_v11 = vsel %vm81_vm1, %v431_v62, %v433_v61  ;;  %v434_v12 = vsel %vm81_vm1, %v429_v60, %v431_v62 }
 0x47d   :  { %v441_v15 = vadd.f32 %v435_v11, %v417_v38  ;;  %v440_v18 = vadd.f32 %v434_v12, %v416_v27 }
 0x4d5   :  { %v517_v14 = vpop.permute.xlu0 %516  ;;  %v515_v4 = vpop.permute.xlu1 %514 }
 0x4d6   :  { %v518_v16 = vsel %vm57_vm0, %v515_v4, %v517_v14  ;;  %v524_v19 = vadd.f32 %v517_v14, %v441_v15  ;;  %v522_v7 = vadd.f32 %v515_v4, %v439_v22 }
 0x4d7   :  { %v523_v1 = vadd.f32 %v518_v16, %v440_v18 }
 0x4d9   :  { %v598_v45 = vpop.permute.xlu1 %597 }
 0x4da   :  { %v600_v20 = vpop.permute.xlu0 %599  ;;  %v605_v5 = vadd.f32 %v598_v45, %v522_v7 }
 0x4db   :  { %v601_v21 = vsel %vm57_vm0, %v598_v45, %v600_v20  ;;  %v607_v42 = vadd.f32 %v600_v20, %v524_v19 }
 0x4dc   :  { %v606_v2 = vadd.f32 %v601_v21, %v523_v1 }
 0x4dd   :  { %616 = vrot.lane.b32.xlu0 %v607_v42, %s765_s0 }
 0x4de   :  { %614 = vrot.lane.b32.xlu1 %v606_v2, %s765_s0 }
 0x4e2   :  { %612 = vrot.lane.b32.xlu1 %v605_v5, %s765_s0 }
 0x54f   :  { %v617_v6 = vpop.permute.xlu0 %616 }
 0x550   :  { %v615_v23 = vpop.permute.xlu1 %614 }
 0x551   :  { %v619_v8 = vsel %vm290_vm4, %v615_v23, %v617_v6 }
 0x552   :  { %625 = vmatprep.subr.mxu1 %v619_v8 }
 0x554   :  { %v613_v24 = vpop.permute.xlu1 %612 }
 0x555   :  { %v618_v26 = vsel %vm290_vm4, %v613_v24, %v615_v23 }
 0x556   :  { %626 = vmatpush1.msra.mxu1 %v618_v26 }
 0x557   :  { %708 = vmatmul.mubr.msk.f32.vlgmr.msra.gmra.mrb[0].mxu1 %vm295_vm5, %v608_v25 }
 0x62a   :  { %v691_v30 = vpop.f32.mrb[0].mxu1 }
 0x62b   :  { %v696_v31 = vadd.f32 %v691_v30, %v828_v13  ;;  %v693_v32 = vpop.f32.mrb[1].mxu1 }
 0x62c   :  { %v697_v33 = vadd.f32 %v693_v32, %v822_v9 }
 0x62d   :  { %698 = vst [vmem:[%s1040_s6] sm:$0xff] %v696_v31 }
 0x62e   :  { %699 = vst [vmem:[%s1040_s6 + $0x8] sm:$0xff] %v697_v33 }

</bundles_post_ra>
